<compile_context>
chip_gen: v7x
topology: tpu7x:2x2x1
jax: 0.10.0
libtpu: 0.0.40
codegen_flags: <defaults>
</compile_context>

<pallas_src>
import functools

import jax
import jax.numpy as jnp
from jax import lax
from jax.experimental import pallas as pl
from jax.experimental.pallas import tpu as pltpu


def _device_kind():
    try:
        return jax.devices()[0].device_kind.lower()
    except Exception:
        return ""


def _choose_q_tile(n_pad, score_budget_bytes):
    """Largest multiple of 128 that divides n_pad with ~10*tq*n_pad <= budget."""
    max_tq = max(128, score_budget_bytes // (10 * n_pad))
    best = 128
    t = 128
    while t <= n_pad:
        if n_pad % t == 0 and t <= max_tq:
            best = t
        t += 128
    return best


def _mhsa_kernel(x_ref, wqkv_ref, bqkv_ref, pos_ref, o_ref, *,
                 d, n_valid, n_pad, tq, num_q_tiles, unroll, use_bf16_exp):
    f32 = jnp.float32
    bf16 = jnp.bfloat16

    x = x_ref[0]                       # (C, n_pad)   bf16 (resident across heads)
    w = wqkv_ref[...]                  # (3d, C)      bf16, this head's q/k/v rows
    bias = bqkv_ref[...]               # (3d, 1)      f32
    pos = pos_ref[...]                 # (d, n_pad)   bf16, this head's rel pos

    # Fused Q/K/V projection: one (3d, C) @ (C, N) MXU call, f32 accumulation.
    qkv = jnp.dot(w, x, preferred_element_type=f32) + bias        # (3d, n_pad) f32
    q_bf = qkv[0:d].astype(bf16)
    k_bf = qkv[d:2 * d].astype(bf16)
    v_bf = qkv[2 * d:3 * d].astype(bf16)

    # Key-side operand of the fused content-content + content-position matmul:
    #   energy[n, m] = sum_d q[d,n] k[d,m] + sum_d pos[d,n] q[d,m]
    b_cat = jnp.concatenate([k_bf, q_bf], axis=0)                 # (2d, n_pad) bf16

    contract_d = (((0,), (0,)), ((), ()))     # contract head_dim axis of both
    contract_key = (((1,), (1,)), ((), ()))   # contract key-pixel axis of both

    # Key-padding mask (only when N was padded up to a lane multiple); f32 so
    # -1e30 and the max-subtraction stay exact.
    if n_pad != n_valid:
        col = lax.broadcasted_iota(jnp.int32, (1, n_pad), 1)
        key_mask = jnp.where(col < n_valid, 0.0, -1e30).astype(f32)
    else:
        key_mask = None

    def attend(start, q_t, pos_t):
        # Per-tile (2d, tq) query-side operand; no full-width a_cat is built.
        a_t = jnp.concatenate([q_t, pos_t], axis=0)               # (2d, tq) bf16
        energy = lax.dot_general(a_t, b_cat, contract_d,
                                 preferred_element_type=f32)      # (tq, n_pad) f32
        if key_mask is not None:
            energy = energy + key_mask
        m = jnp.max(energy, axis=-1, keepdims=True)
        s = energy - m                                            # f32, <= 0
        if use_bf16_exp:
            # v6e/v7x: bf16 EUP halves the exp stream; sums stay f32.
            p = jnp.exp(s.astype(bf16)).astype(f32)
        else:
            # v5e: no bf16 EUP; exp stays f32 (MXU-bound there anyway).
            p = jnp.exp(s)
        attn = p * pl.reciprocal(jnp.sum(p, axis=-1, keepdims=True), approx=True)
        # out[d, n_q] = sum_m v[d, m] * attn[n_q, m]
        out_t = lax.dot_general(v_bf, attn.astype(bf16), contract_key,
                                preferred_element_type=f32)       # (d, tq) f32
        # Dense, lane-aligned store (start is a multiple of 128).
        o_ref[0, :, pl.ds(start, tq)] = out_t.astype(o_ref.dtype)

    if num_q_tiles == 1:
        attend(0, q_bf, pos)
    else:
        def body(qi, carry):
            start = pl.multiple_of(qi * tq, 128)
            attend(start,
                   lax.dynamic_slice_in_dim(q_bf, start, tq, axis=1),
                   lax.dynamic_slice_in_dim(pos, start, tq, axis=1))
            return carry
        lax.fori_loop(0, num_q_tiles, body, 0, unroll=unroll)


def mhsa_forward(x, wq, bq, wk, bk, wv, bv, rel_h, rel_w, heads, *, q_tile=None):
    B, C, W, H = x.shape
    assert C % heads == 0
    d = C // heads
    assert d % 8 == 0, "head_dim must be a multiple of 8 for TPU sublane tiling"
    N = W * H
    n_pad = ((N + 127) // 128) * 128

    # Generation-aware tiling / VMEM policy.
    kind = _device_kind()
    is_v7 = "v7" in kind
    use_bf16_exp = ("v6" in kind) or is_v7          # bf16 EUP only on v6e/v7x
    vmem_cap = (64 if is_v7 else 128) << 20         # physical VMEM per core
    score_budget = (12 if is_v7 else 32) << 20      # live softmax working set
    tq = q_tile if q_tile is not None else _choose_q_tile(n_pad, score_budget)
    assert n_pad % tq == 0 and tq % 128 == 0
    num_q_tiles = n_pad // tq
    unroll = num_q_tiles if num_q_tiles <= 4 else 2

    f32 = jnp.float32
    bf16 = jnp.bfloat16

    x_flat = x.reshape(B, C, N)
    # (1,heads,d,1,H) + (1,heads,d,W,1) -> (1,heads,d,W,H) -> (C, N)
    pos = (rel_h + rel_w).reshape(C, N)
    if n_pad != N:
        x_flat = jnp.pad(x_flat, ((0, 0), (0, 0), (0, n_pad - N)))
        pos = jnp.pad(pos, ((0, 0), (0, n_pad - N)))
    x_bf = x_flat.astype(bf16)
    pos_bf = pos.astype(bf16)                        # bf16: halves per-step DMA

    # Stack per-head q/k/v weight rows -> (heads*3d, C) bf16, biases -> f32.
    wqkv = jnp.concatenate(
        [wq.reshape(heads, d, C), wk.reshape(heads, d, C), wv.reshape(heads, d, C)],
        axis=1).reshape(heads * 3 * d, C).astype(bf16)
    bqkv = jnp.concatenate(
        [bq.reshape(heads, d), bk.reshape(heads, d), bv.reshape(heads, d)],
        axis=1).reshape(heads * 3 * d, 1).astype(f32)

    # Shape-aware VMEM estimate: double-buffered pipeline blocks + body temps.
    est = (2 * C * n_pad * 2          # x block (bf16), 2 buffers
           + 2 * 3 * d * C * 2        # wqkv block
           + 2 * 3 * d * 4            # bqkv block
           + 2 * d * n_pad * 2        # pos block
           + 2 * d * n_pad * 4        # output block (f32)
           + 3 * d * n_pad * 4        # qkv f32
           + 5 * d * n_pad * 2        # q/k/v bf16 + b_cat
           + 10 * tq * n_pad          # energy + p (f32) + attn (bf16)
           + (4 << 20))               # slack
    vmem_limit = int(min(max(est, 32 << 20), (vmem_cap * 3) // 4))

    kernel = functools.partial(
        _mhsa_kernel, d=d, n_valid=N, n_pad=n_pad, tq=tq,
        num_q_tiles=num_q_tiles, unroll=unroll, use_bf16_exp=use_bf16_exp)

    head_rows = lambda b, h: (h, 0)   # per-head row block of weights/bias/pos

    out_pad = pl.pallas_call(
        kernel,
        out_shape=jax.ShapeDtypeStruct((B, C, n_pad), f32),
        grid_spec=pltpu.PrefetchScalarGridSpec(
            num_scalar_prefetch=0,
            grid=(B, heads),   # heads innermost: x block stays resident across heads
            in_specs=[
                pl.BlockSpec((1, C, n_pad), lambda b, h: (b, 0, 0)),   # x (bf16)
                pl.BlockSpec((3 * d, C), head_rows),                   # fused wqkv rows
                pl.BlockSpec((3 * d, 1), head_rows),                   # fused biases
                pl.BlockSpec((d, n_pad), head_rows),                   # pos (bf16)
            ],
            out_specs=pl.BlockSpec((1, d, n_pad), lambda b, h: (b, h, 0)),
        ),
        compiler_params=pltpu.CompilerParams(
            dimension_semantics=("parallel", "parallel"),
            vmem_limit_bytes=vmem_limit,
        ),
    )(x_bf, wqkv, bqkv, pos_bf)

    # TODO(synk): fuse this unpad/reshape into the consumer (or emit bf16)
    # to save one HBM round-trip when N != n_pad / downstream tolerates bf16.
    return out_pad[:, :, :N].reshape(B, C, W, H)


def mhsa_reference(x, wq, bq, wk, bk, wv, bv, rel_h, rel_w, heads):
    """Pure-JAX f32 reference mirroring the PyTorch forward exactly."""
    B, C, W, H = x.shape
    d = C // heads
    N = W * H
    xf = x.reshape(B, C, N)
    q = (jnp.einsum('oc,bcn->bon', wq, xf) + bq[None, :, None]).reshape(B, heads, d, N)
    k = (jnp.einsum('oc,bcn->bon', wk, xf) + bk[None, :, None]).reshape(B, heads, d, N)
    v = (jnp.einsum('oc,bcn->bon', wv, xf) + bv[None, :, None]).reshape(B, heads, d, N)
    cc = jnp.einsum('bhdq,bhdk->bhqk', q, k)
    pos = (rel_h + rel_w).reshape(heads, d, N)
    cp = jnp.einsum('hdn,bhdm->bhnm', pos, q)
    energy = cc + cp
    attn = jax.nn.softmax(energy, axis=-1)
    out = jnp.einsum('bhdn,bhmn->bhdm', v, attn)
    return out.reshape(B, C, W, H)


def _make_inputs(key, B, C, W, H, heads):
    d = C // heads
    keys = jax.random.split(key, 9)
    x = jax.random.normal(keys[0], (B, C, W, H), dtype=jnp.float32)
    wq = jax.random.normal(keys[1], (C, C), dtype=jnp.float32) * 0.1
    wk = jax.random.normal(keys[2], (C, C), dtype=jnp.float32) * 0.1
    wv = jax.random.normal(keys[3], (C, C), dtype=jnp.float32) * 0.1
    bq = jax.random.normal(keys[4], (C,), dtype=jnp.float32) * 0.1
    bk = jax.random.normal(keys[5], (C,), dtype=jnp.float32) * 0.1
    bv = jax.random.normal(keys[6], (C,), dtype=jnp.float32) * 0.1
    rel_h = jax.random.normal(keys[7], (1, heads, d, 1, H), dtype=jnp.float32)
    rel_w = jax.random.normal(keys[8], (1, heads, d, W, 1), dtype=jnp.float32)
    return x, wq, bq, wk, bk, wv, bv, rel_h, rel_w


if __name__ == "__main__":
    key = jax.random.PRNGKey(0)
    k1, k2 = jax.random.split(key)

    # Case 1: N=64 -> pad-to-128 + key-mask path, single q tile.
    B, C, W, H, heads = 2, 32, 8, 8, 4
    args = _make_inputs(k1, B, C, W, H, heads)
    out = jax.block_until_ready(mhsa_forward(*args, heads))
    ref = mhsa_reference(*args, heads)
    assert out.shape == (B, C, W, H)
    max_err = jnp.max(jnp.abs(out - ref))
    assert jnp.allclose(out, ref, atol=5e-2, rtol=5e-2), (
        f"case1 mismatch vs reference, max abs err {max_err}")

    # Case 2: N=256 (no padding, no mask), forced tq=128 to exercise the
    # unrolled q-tile loop path at small scale.
    B2, C2, W2, H2, heads2 = 2, 32, 16, 16, 4
    args2 = _make_inputs(k2, B2, C2, W2, H2, heads2)
    out2 = jax.block_until_ready(mhsa_forward(*args2, heads2, q_tile=128))
    ref2 = mhsa_reference(*args2, heads2)
    assert out2.shape == (B2, C2, W2, H2)
    max_err2 = jnp.max(jnp.abs(out2 - ref2))
    assert jnp.allclose(out2, ref2, atol=5e-2, rtol=5e-2), (
        f"case2 mismatch vs reference, max abs err {max_err2}")

    print("KERNEL_OK")
</pallas_src>

<mosaic_0001>
module attributes {stable_mosaic.version = 11 : i64} {
  func.func @_mhsa_kernel(%arg0: i32, %arg1: i32, %arg2: memref<1x32x128xbf16, #tpu.memory_space<vmem>>, %arg3: memref<24x32xbf16, #tpu.memory_space<vmem>>, %arg4: memref<24x1xf32, #tpu.memory_space<vmem>>, %arg5: memref<8x128xbf16, #tpu.memory_space<vmem>>, %arg6: memref<1x8x128xf32, #tpu.memory_space<vmem>>) attributes {dimension_semantics = [#tpu.dimension_semantics<parallel>, #tpu.dimension_semantics<parallel>], iteration_bounds = array<i64: 2, 4>, scalar_prefetch = 0 : i64, scratch_operands = 0 : i64, tpu.core_type = #tpu.core_type<tc>, window_params = [{transform_indices = @transform_0, window_bounds = array<i64: 1, 32, 128>}, {transform_indices = @transform_1, window_bounds = array<i64: 24, 32>}, {transform_indices = @transform_2, window_bounds = array<i64: 24, 1>}, {transform_indices = @transform_3, window_bounds = array<i64: 8, 128>}, {transform_indices = @transform_4, window_bounds = array<i64: 1, 8, 128>}]} {
    %c0 = arith.constant 0 : index
    %c0_0 = arith.constant 0 : index
    %c0_1 = arith.constant 0 : index
    %0 = vector.load %arg2[%c0, %c0_0, %c0_1] : memref<1x32x128xbf16, #tpu.memory_space<vmem>>, vector<1x32x128xbf16>
    %1 = vector.shape_cast %0 : vector<1x32x128xbf16> to vector<32x128xbf16>
    %c0_2 = arith.constant 0 : index
    %c0_3 = arith.constant 0 : index
    %2 = vector.load %arg3[%c0_2, %c0_3] : memref<24x32xbf16, #tpu.memory_space<vmem>>, vector<24x32xbf16>
    %c0_4 = arith.constant 0 : index
    %c0_5 = arith.constant 0 : index
    %3 = vector.load %arg4[%c0_4, %c0_5] : memref<24x1xf32, #tpu.memory_space<vmem>>, vector<24x1xf32>
    %c0_6 = arith.constant 0 : index
    %c0_7 = arith.constant 0 : index
    %4 = vector.load %arg5[%c0_6, %c0_7] : memref<8x128xbf16, #tpu.memory_space<vmem>>, vector<8x128xbf16>
    %cst = arith.constant dense<0.000000e+00> : vector<24x128xf32>
    %5 = tpu.matmul %2, %1, %cst {dimension_numbers = #tpu.dot_dimension_numbers<[1], [0], [0], [1], [0, 0, 1, 1], [], []>} : vector<24x32xbf16>, vector<32x128xbf16>, vector<24x128xf32> -> vector<24x128xf32>
    %6 = vector.broadcast %3 : vector<24x1xf32> to vector<24x128xf32>
    %7 = arith.addf %5, %6 : vector<24x128xf32>
    %8 = vector.extract_strided_slice %7 {offsets = [0, 0], sizes = [8, 128], strides = [1, 1]} : vector<24x128xf32> to vector<8x128xf32>
    %9 = arith.truncf %8 : vector<8x128xf32> to vector<8x128xbf16>
    %10 = vector.extract_strided_slice %7 {offsets = [8, 0], sizes = [8, 128], strides = [1, 1]} : vector<24x128xf32> to vector<8x128xf32>
    %11 = arith.truncf %10 : vector<8x128xf32> to vector<8x128xbf16>
    %12 = vector.extract_strided_slice %7 {offsets = [16, 0], sizes = [8, 128], strides = [1, 1]} : vector<24x128xf32> to vector<8x128xf32>
    %13 = arith.truncf %12 : vector<8x128xf32> to vector<8x128xbf16>
    %14 = tpu.concatenate %11, %9 in 0 : vector<8x128xbf16>, vector<8x128xbf16> -> vector<16x128xbf16>
    %15 = tpu.iota {dimensions = array<i32: 1>} : vector<1x128xi32>
    %c64_i32 = arith.constant 64 : i32
    %16 = vector.broadcast %c64_i32 : i32 to vector<1x128xi32>
    %17 = arith.cmpi slt, %15, %16 : vector<1x128xi32>
    %cst_8 = arith.constant 0.000000e+00 : f32
    %cst_9 = arith.constant -1.000000e+30 : f32
    %18 = vector.broadcast %cst_8 : f32 to vector<1x128xf32>
    %19 = vector.broadcast %cst_9 : f32 to vector<1x128xf32>
    %20 = arith.select %17, %18, %19 : vector<1x128xi1>, vector<1x128xf32>
    %21 = tpu.concatenate %9, %4 in 0 : vector<8x128xbf16>, vector<8x128xbf16> -> vector<16x128xbf16>
    %cst_10 = arith.constant dense<0.000000e+00> : vector<128x128xf32>
    %22 = tpu.matmul %21, %14, %cst_10 {dimension_numbers = #tpu.dot_dimension_numbers<[0], [0], [1], [1], [0, 1, 1, 1], [], []>} : vector<16x128xbf16>, vector<16x128xbf16>, vector<128x128xf32> -> vector<128x128xf32>
    %23 = vector.broadcast %20 : vector<1x128xf32> to vector<128x128xf32>
    %24 = arith.addf %22, %23 : vector<128x128xf32>
    %cst_11 = arith.constant dense<0xFF800000> : vector<128xf32>
    %25 = vector.multi_reduction <maximumf>, %24, %cst_11 [1] : vector<128x128xf32> to vector<128xf32>
    %26 = vector.shape_cast %25 : vector<128xf32> to vector<128x1xf32>
    %27 = vector.broadcast %26 : vector<128x1xf32> to vector<128x128xf32>
    %28 = arith.subf %24, %27 : vector<128x128xf32>
    %29 = math.exp %28 : vector<128x128xf32>
    %cst_12 = arith.constant dense<0.000000e+00> : vector<128xf32>
    %30 = vector.multi_reduction <add>, %29, %cst_12 [1] : vector<128x128xf32> to vector<128xf32>
    %31 = vector.shape_cast %30 : vector<128xf32> to vector<128x1xf32>
    %32 = tpu.reciprocal %31 {approx = true} : vector<128x1xf32> -> vector<128x1xf32>
    %33 = vector.broadcast %32 : vector<128x1xf32> to vector<128x128xf32>
    %34 = arith.mulf %29, %33 : vector<128x128xf32>
    %35 = arith.truncf %34 : vector<128x128xf32> to vector<128x128xbf16>
    %cst_13 = arith.constant dense<0.000000e+00> : vector<8x128xf32>
    %36 = tpu.matmul %13, %35, %cst_13 {dimension_numbers = #tpu.dot_dimension_numbers<[1], [1], [0], [0], [0, 0, 1, 0], [], []>} : vector<8x128xbf16>, vector<128x128xbf16>, vector<8x128xf32> -> vector<8x128xf32>
    %c0_14 = arith.constant 0 : index
    %c0_15 = arith.constant 0 : index
    %c0_16 = arith.constant 0 : index
    %37 = vector.load %arg6[%c0_14, %c0_15, %c0_16] : memref<1x8x128xf32, #tpu.memory_space<vmem>>, vector<1x8x128xf32>
    %38 = vector.shape_cast %37 : vector<1x8x128xf32> to vector<8x128xf32>
    %39 = vector.shape_cast %36 : vector<8x128xf32> to vector<1x8x128xf32>
    tpu.vector_store %arg6[%c0_14, %c0_15, %c0_16], %39 {strides = array<i32>} : memref<1x8x128xf32, #tpu.memory_space<vmem>>, vector<1x8x128xf32>,
    return
  }
  func.func @transform_0(%arg0: i32, %arg1: i32) -> (i32, i32, i32) {
    %c0_i32 = arith.constant 0 : i32
    %c0_i32_0 = arith.constant 0 : i32
    %c0_i32_1 = arith.constant 0 : i32
    return %arg0, %c0_i32, %c0_i32_0 : i32, i32, i32
  }
  func.func @transform_1(%arg0: i32, %arg1: i32) -> (i32, i32) {
    %c0_i32 = arith.constant 0 : i32
    %c0_i32_0 = arith.constant 0 : i32
    return %arg1, %c0_i32 : i32, i32
  }
  func.func @transform_2(%arg0: i32, %arg1: i32) -> (i32, i32) {
    %c0_i32 = arith.constant 0 : i32
    %c0_i32_0 = arith.constant 0 : i32
    return %arg1, %c0_i32 : i32, i32
  }
  func.func @transform_3(%arg0: i32, %arg1: i32) -> (i32, i32) {
    %c0_i32 = arith.constant 0 : i32
    %c0_i32_0 = arith.constant 0 : i32
    return %arg1, %c0_i32 : i32, i32
  }
  func.func @transform_4(%arg0: i32, %arg1: i32) -> (i32, i32, i32) {
    %c0_i32 = arith.constant 0 : i32
    %c0_i32_0 = arith.constant 0 : i32
    return %arg0, %arg1, %c0_i32 : i32, i32, i32
  }
}

</mosaic_0001>

<bundles_post_ra>
// kernel: tpu_custom_call.1
= control target key start
LH: loop header
LB: loop body
LE: loop exit
PB: predicated region body
PF: predicated region fallthrough
CT: control target
= control target key end

     0   :  { %9 = vsyncpa [#allocation3], 0  ;;  %s1485_s0 = inlined_call_operand.vmem [shape: bf16[2,32,128], index: 0, kind: input, shape index: {}]   ;;  %s1486_s1 = inlined_call_operand.vmem [shape: bf16[96,32], index: 1, kind: input, shape index: {}]   ;;  %s1487_s2 = inlined_call_operand.vmem [shape: f32[96,1], index: 2, kind: input, shape index: {}]   ;;  %s1488_s3 = inlined_call_operand.vmem [shape: bf16[32,128], index: 3, kind: input, shape index: {}]   ;;  %s1489_s4 = inlined_call_operand.hbm [shape: f32[2,32,128], index: 4, kind: output, shape index: {}]  }
   0x1   :  { %11 = vsyncpa [#allocation3 + $0x1], 0  ;;  %s1221_s15 = smov 0   ;;  %s1223_s16 = smov 0  }
   0x2   :  { %s1225_s17 = smov 0   ;;  %s1227_s18 = smov 0  }
   0x3   :  { %s1229_s19 = smov 0   ;;  %s1231_s20 = smov 0  }
   0x4   :  { %s1233_s21 = smov 0   ;;  %s1235_s22 = smov 0  }
   0x5 LB: > { %s849_s23 = sadd.s32 4294967295, %s1189_s22   ;;  %s850_s24 = sadd.s32 4294967294, %s1189_s22   ;;  %s1189_s22 = sphi %s1235_s22, %s17_s22   ;;  %s1185_s21 = sphi %s1233_s21, %s1498_s21   ;;  %s1181_s20 = sphi %s1231_s20, %s1497_s20   ;;  %s1177_s19 = sphi %s1229_s19, %s1496_s19   ;;  %s1173_s18 = sphi %s1227_s18, %s1495_s18   ;;  %s1169_s17 = sphi %s1225_s17, %s1494_s17   ;;  %s1165_s16 = sphi %s1223_s16, %s1493_s16   ;;  %s1161_s15 = sphi %s1221_s15, %s1492_s15  }
   0x6   : > { %s26_s25 = sadd.s32 1, %s1181_s20  ;;  %s29_s26 = sadd.s32 1, %s1185_s21 }
   0x7   : > { %p27_p0 = scmp.ge.s32.totalorder %s26_s25, 4  ;;  %p152_p1 = scmp.ne.s32.totalorder %s1169_s17, %s1165_s16 }
   0x8   : > { %p153_p2 = scmp.eq.s32.totalorder %s849_s23, 7  ;;  %p158_p5 = scmp.ne.s32.totalorder %s1165_s16, %s1161_s15 }
   0x9   : > { %s1500_s25 = smov (%p27_p0, %s26_s25), 0  ;;  %s1502_s26 = smov (!%p27_p0, %s29_s26), %s1185_s21 }
   0xa   : > { %s138_s27 = ssub.s32 %s1181_s20, %s1500_s25  ;;  %p1272_p3 = por %p153_p2, %p152_p1 }
   0xb   : > { %p31_p4 = scmp.ge.s32.totalorder %s1502_s26, 2  ;;  %p159_p6 = scmp.eq.s32.totalorder %s850_s24, 7 }
   0xc   : > { %p853_p7 = scmp.ge.s32.totalorder %s1189_s22, 1  ;;  %p210_p9 = scmp.lt.s32.totalorder %s1189_s22, 9 }
   0xd   : > { %s1504_s26 = smov (%p31_p4, %s1502_s26), 0  ;;  %p1281_p8 = por %p159_p6, %p158_p5 }
   0xe   : > { %s137_s30 = ssub.s32 %s1185_s21, %s1504_s26  ;;  %s142_s5 = sadd.s32 1, %s1169_s17 }
   0xf   : > { %s139_s6 = sor.u32 %s138_s27, %s137_s30  ;;  %p211_p10 = pnand %p853_p7, %p210_p9 }
  0x10   : > { %p140_p11 = scmp.eq.s32.totalorder %s139_s6, 0  ;;  %p250_p12 = scmp.lt.s32.totalorder (!%p211_p10), %s1177_s19, 1  ;;  %v1191_v0 = vmov (!%p211_p10), 0   ;;  %vm318_vm0 = vcmask (!%p211_p10), 261120   ;;  %vm378_vm1 = vcmask (!%p211_p10), 1043456   ;;  %vm410_vm2 = vcmask (!%p211_p10), 130048  }
  0x11   : > { %214 = sbr.rel (%p211_p10) target bundleno = 1183 (0x49f), region = 36  ;;  %1024 = vset.pattern.permute.xlu0 (!%p211_p10), %v1191_v0  ;;  %p267_p0 = scmp.lt.s32.totalorder (!%p211_p10), %s1173_s18, 3  ;;  %v383_v29 = vlaneseq (!%p211_p10)  ;;  %v1192_v31 = vmov (!%p211_p10), -1e+30   ;;  %vm1194_vm4 = vmmov (!%p211_p10), 0  }
  0x12   : > { %s1290_s7 = scalar_select %p140_p11, %s1169_s17, %s142_s5  }
  0x13   : > { %s255_s8 = smul.u32 (!%p211_p10), 3, %s1173_s18  ;;  %v384_v30 = vand.u32 (!%p211_p10), 127, %v383_v29  ;;  %s876_s24 = sshll.u32 (!%p211_p10), %s1177_s19, 2 }
  0x14   : > { %s737_s27 = sadd.s32 (!%p211_p10), %s1173_s18, %s876_s24 }
  0x15   : > { %p256_p13 = scmp.lt.s32.totalorder (!%p211_p10), %s255_s8, 11  ;;  %vm385_vm3 = vcmp.lt.s32.totalorder (!%p211_p10), %v384_v30, 64  ;;  %s877_s6 = sshll.u32 (!%p211_p10), %s737_s27, 7 }
  0x16   : > { %v386_v32 = vsel (!%p211_p10), %vm385_vm3, 0.0, %v1192_v31 }
  0x18   : > { %s251_s9 = scalar_select %p250_p12, %s1177_s19, 1 }
  0x19   : > { %s1506_s8 = smov (!%p256_p13, %s255_s8), 11 }
  0x1a   : > { %s880_s10 = sshll.u32 %s251_s9, 4  ;;  %s857_s14 = sshll.u32 %s1506_s8, 2 }
  0x1b   : > { %s254_s13 = scalar_lea.vmem %s1485_s0, %s880_s10  ;;  %s858_s23 = sshll.u32 %s1506_s8, 3 }
  0x1c   : > { %v1026_v1 = vld [vmem:[%s254_s13] sm:$0xff]   ;;  %v1027_v2 = vld [vmem:[%s254_s13 + $0x8] sm:$0xff]   ;;  %s259_s30 = scalar_lea.vmem %s1486_s1, %s857_s14  ;;  %s1304_s9 = scalar_lea.vmem %s1487_s2, %s858_s23 }
  0x1d   : > { %903 = vmatprep.subr.bf16.mxu0 %v1026_v1  ;;  %v1028_v3 = vld [vmem:[%s259_s30] sm:$0xff]   ;;  %v1029_v5 = vld [vmem:[%s259_s30 + $0x8] ss:$0 sps:$4 sm:$0xff]   ;;  %s268_s8 = scalar_select %p267_p0, %s1173_s18, 3 }
  0x1e   : > { %904 = vmatpush3.bf16.msra.mxu0 %v1026_v1  ;;  %v279_v4 = vld [vmem:[%s1304_s9] sm:$0xff]  ;;  %907 = vmatprep.mubr.msk.bf16.mxu0 %vm318_vm0, %v1028_v3  ;;  %v280_v6 = vld [vmem:[%s1304_s9 + $0x8] sm:$0xff]  ;;  %s247_s14 = sand.u32 1, %s1165_s16   ;;  %s1195_s18 = smov [#allocation2]  }
  0x1f   : > { %905 = vmatprep.subr.bf16.mxu0 %v1027_v2  ;;  %285 = vperm.xlu0 %1024, %v279_v4   ;;  %s859_s10 = sshll.u32 %s268_s8, 2  ;;  %s854_s23 = sshll.u32 %s247_s14, 3 }
  0x20   : > { %s270_s13 = scalar_lea.vmem %s1488_s3, %s859_s10  ;;  %s249_s30 = scalar_lea.vmem [#allocation2], %s854_s23 }
  0x21   : > { %v1030_v12 = vld [vmem:[%s270_s13] ss:$0 sps:$4 sm:$0xff]   ;;  %s741_s5 = sshll.u32 %s249_s30, 4  ;;  %s1434_s10 = scalar_lea.hbm %s1489_s4, %s877_s6  ;;  %s1429_s5 = int_to_ptr.vmem [resolvable:$true] %s741_s5 }
  0x22   : > { %906 = vmatpush3.bf16.msra.mxu0 %v1027_v2  ;;  %s726_s11 = scalar_lea.sflag [#allocation3], %s247_s14  ;;  %s1095_s19 = scalar_lea.vmem %s1429_s5, 128 }
  0x23   : > { %290 = vperm.xlu0 %1024, %v280_v6   ;;  %p1096_p1 = scmp.ne.s32.totalorder %s1429_s5, %s1095_s19  ;;  %s1099_s12 = sshll.u32 %s1195_s18, 4  ;;  %s1100_s12 = int_to_ptr.vmem [resolvable:$false] %s1099_s12 }
  0x24   : > { %s1101_s13 = scalar_lea.vmem %s1100_s12, 256  ;;  %p1102_p5 = scmp.lt.s32.totalorder %s1429_s5, %s1100_s12 }
  0x25   : > { %908 = vmatmul.mubr.msk.bf16.vlgmr.msra.gmra.mrb[0].mxu0 %vm318_vm0, %v1029_v5  ;;  %p1097_p2 = pnand %p1096_p1, %p1272_p3  ;;  %p1103_p6 = scmp.lt.s32.totalorder %s1101_s13, %s1095_s19 }
  0x27   : > { %p1098_p4 = pneg %p1097_p2  ;;  %p1104_p7 = por %p1103_p6, %p1102_p5 }
  0x29   : > { %p1105_p9 = pnand %p1104_p7, %p1098_p4 }
  0x9e   : > { %v286_v7 = vpop.permute.xlu0 %285 }
  0xa2   : > { %v291_v13 = vpop.permute.xlu0 %290 }
  0xf8   : > { %v1313_v8 = vpop.f32.mrb[0].mxu0 }
  0xf9   : > { %v359_v9 = vpop.f32.mrb[1].mxu0 }
  0xfa   : > { %v360_v10 = vadd.f32 %v359_v9, %v286_v7  ;;  %v910_v11 = vpop.f32.mrb[2].mxu0 }
  0xfb   : > { %v362_v14 = vpop.f32.mrb[3].mxu0 }
  0xfc   : > { %v373_v15 = vpack.c.bf16 %v360_v10, %v360_v10  ;;  %v363_v16 = vadd.f32 %v362_v14, %v291_v13 }
  0xfe   : > { %v377_v17 = vrot.slane %v373_v15, 4  ;;  %v374_v18 = vpack.c.bf16 %v363_v16, %v363_v16  ;;  %v392_v19 = vsel %vm378_vm1, %v373_v15, %v1030_v12 }
  0xff   : > { %394 = vxpose.xlu1.c.b16.start.end [1/1] (short) %v392_v19, 128 }
 0x100   : > { %v381_v20 = vsel %vm378_vm1, %v374_v18, %v377_v17 }
 0x101   : > { %911 = vmatprep.subr.bf16.mxu0 %v381_v20 }
 0x102   : > { %912 = vmatpush3.bf16.msra.mxu0 %v381_v20 }
 0x103   : > { %1025 = vset.pattern.permute.xlu1 %v1191_v0 }
 0x165   : > { %v402_v21 = vpop.trf.xlu1 }
 0x166   : > { %913 = vmatprep.mubr.msk.bf16.mxu0 %vm410_vm2, %v402_v21 }
 0x169   : > { %v403_v22 = vpop.trf.xlu1 }
 0x16a   : > { %914 = vmatmul.mubr.msk.bf16.vlgmr.msra.gmra.mrb[4].mxu0 %vm410_vm2, %v403_v22 }
 0x16d   : > { %v404_v23 = vpop.trf.xlu1 }
 0x16e   : > { %917 = vmatprep.mubr.msk.bf16.mxu0 %vm410_vm2, %v404_v23 }
 0x171   : > { %v405_v24 = vpop.trf.xlu1 }
 0x172   : > { %918 = vmatmul.mubr.msk.bf16.gmra.mrb[8].mxu0 %vm410_vm2, %v405_v24 }
 0x175   : > { %v406_v25 = vpop.trf.xlu1 }
 0x176   : > { %921 = vmatprep.mubr.msk.bf16.mxu0 %vm410_vm2, %v406_v25 }
 0x179   : > { %v407_v26 = vpop.trf.xlu1 }
 0x17a   : > { %922 = vmatmul.mubr.msk.bf16.gmra.mrb[12].mxu0 %vm410_vm2, %v407_v26 }
 0x17d   : > { %v408_v27 = vpop.trf.xlu1 }
 0x17e   : > { %925 = vmatprep.mubr.msk.bf16.mxu0 %vm410_vm2, %v408_v27 }
 0x181   : > { %v409_v28 = vpop.trf.xlu1 }
 0x182   : > { %926 = vmatmul.mubr.msk.bf16.gmra.mrb[16].mxu0 %vm410_vm2, %v409_v28 }
 0x23d   : > { %v915_v33 = vpop.f32.mrb[4].mxu0 }
 0x23e   : > { %v469_v34 = vpop.f32.mrb[5].mxu0  ;;  %v478_v39 = vadd.f32 %v915_v33, %v386_v32 }
 0x23f   : > { %v470_v35 = vadd.f32 %v469_v34, %v386_v32  ;;  %v916_v36 = vpop.f32.mrb[6].mxu0 }
 0x240   : > { %v472_v37 = vpop.f32.mrb[7].mxu0  ;;  %v481_v45 = vadd.f32 %v916_v36, %v386_v32 }
 0x241   : > { %v473_v38 = vadd.f32 %v472_v37, %v386_v32  ;;  %532 = vmax.xlane.f32.xlu1 %v470_v35 }
 0x243   : > { %534 = vmax.xlane.f32.xlu0 %v473_v38 }
 0x245   : > { %v919_v40 = vpop.f32.mrb[8].mxu0 }
 0x246   : > { %v485_v41 = vpop.f32.mrb[9].mxu0  ;;  %v494_v46 = vadd.f32 %v919_v40, %v386_v32 }
 0x247   : > { %v486_v42 = vadd.f32 %v485_v41, %v386_v32  ;;  %536 = vmax.xlane.f32.xlu0 %v478_v39  ;;  %v920_v43 = vpop.f32.mrb[10].mxu0 }
 0x248   : > { %v488_v44 = vpop.f32.mrb[11].mxu0  ;;  %v497_v53 = vadd.f32 %v920_v43, %v386_v32 }
 0x249   : > { %540 = vmax.xlane.f32.xlu1 %v486_v42  ;;  %v489_v47 = vadd.f32 %v488_v44, %v386_v32 }
 0x24b   : > { %538 = vmax.xlane.f32.xlu0 %v481_v45 }
 0x24d   : > { %v923_v48 = vpop.f32.mrb[12].mxu0  ;;  %544 = vmax.xlane.f32.xlu1 %v494_v46 }
 0x24e   : > { %v501_v49 = vpop.f32.mrb[13].mxu0  ;;  %v1323_v54 = vadd.f32 %v923_v48, %v386_v32 }
 0x24f   : > { %v502_v50 = vadd.f32 %v501_v49, %v386_v32  ;;  %542 = vmax.xlane.f32.xlu0 %v489_v47  ;;  %v924_v51 = vpop.f32.mrb[14].mxu0 }
 0x250   : > { %v504_v52 = vpop.f32.mrb[15].mxu0  ;;  %v1328_v58 = vadd.f32 %v924_v51, %v386_v32 }
 0x251   : > { %548 = vmax.xlane.f32.xlu1 %v502_v50  ;;  %v1325_v55 = vadd.f32 %v504_v52, %v386_v32 }
 0x253   : > { %546 = vmax.xlane.f32.xlu0 %v497_v53 }
 0x255   : > { %v927_v56 = vpop.f32.mrb[16].mxu0  ;;  %552 = vmax.xlane.f32.xlu1 %v1323_v54 }
 0x256   : > { %v517_v57 = vpop.f32.mrb[17].mxu0  ;;  %v1333_v62 = vadd.f32 %v927_v56, %v386_v32 }
 0x257   : > { %v1330_v59 = vadd.f32 %v517_v57, %v386_v32  ;;  %550 = vmax.xlane.f32.xlu0 %v1325_v55  ;;  %v928_v60 = vpop.f32.mrb[18].mxu0 }
 0x258   : > { %v520_v61 = vpop.f32.mrb[19].mxu0  ;;  %v1340_v0 = vadd.f32 %v928_v60, %v386_v32 }
 0x259   : > { %556 = vmax.xlane.f32.xlu1 %v1330_v59  ;;  %v1337_v63 = vadd.f32 %v520_v61, %v386_v32 }
 0x25b   : > { %554 = vmax.xlane.f32.xlu0 %v1328_v58 }
 0x25d   : > { %560 = vmax.xlane.f32.xlu1 %v1333_v62 }
 0x25f   : > { %558 = vmax.xlane.f32.xlu0 %v1337_v63 }
 0x263   : > { %562 = vmax.xlane.f32.xlu0 %v1340_v0 }
 0x2ce   : > { %v533_v1 = vpop.xlane.xlu1 %532 }
 0x2cf   : > { %v564_v2 = vsub.f32 %v470_v35, %v533_v1  ;;  %v1193_v1 = vmov 0.0  }
 0x2d0   : > { %v535_v3 = vpop.xlane.xlu0 %534  ;;  %929 = vmatprep.subr.bf16.mxu1 %v1193_v1  ;;  %945 = vmatprep.mubr.msk.bf16.mxu1 %vm1194_vm4, %v1193_v1 }
 0x2d1   : > { %v580_v4 = vmul.f32 1.442695, %v564_v2  ;;  %v565_v5 = vsub.f32 %v473_v38, %v535_v3  ;;  %v281_v3 = vld [vmem:[%s1304_s9 + $0x10] sm:$0xff] }
 0x2d3   : > { %1031 = vpow2.f32 %v580_v4  ;;  %v582_v6 = vmul.f32 1.442695, %v565_v5 }
 0x2d4   : > { %v537_v7 = vpop.xlane.xlu0 %536 }
 0x2d5   : > { %1033 = vpow2.f32 %v582_v6  ;;  %v566_v9 = vsub.f32 %v478_v39, %v537_v7 }
 0x2d6   : > { %v541_v10 = vpop.xlane.xlu1 %540 }
 0x2d7   : > { %v584_v11 = vmul.f32 1.442695, %v566_v9  ;;  %v568_v12 = vsub.f32 %v486_v42, %v541_v10 }
 0x2d8   : > { %v539_v13 = vpop.xlane.xlu0 %538 }
 0x2d9   : > { %1035 = vpow2.f32 %v584_v11  ;;  %v588_v14 = vmul.f32 1.442695, %v568_v12  ;;  %v567_v15 = vsub.f32 %v481_v45, %v539_v13 }
 0x2da   : > { %v545_v16 = vpop.xlane.xlu1 %544 }
 0x2db   : > { %v586_v17 = vmul.f32 1.442695, %v567_v15  ;;  %v570_v18 = vsub.f32 %v494_v46, %v545_v16  ;;  %1037 = vpow2.f32 %v588_v14 }
 0x2dc   : > { %v543_v19 = vpop.xlane.xlu0 %542 }
 0x2dd   : > { %v1344_v20 = vpop.eup %1031  ;;  %1039 = vpow2.f32 %v586_v17  ;;  %v592_v21 = vmul.f32 1.442695, %v570_v18  ;;  %v569_v22 = vsub.f32 %v489_v47, %v543_v19 }
 0x2de   : > { %612 = vadd.xlane.f32.xlu1 %v1344_v20  ;;  %v549_v23 = vpop.xlane.xlu1 %548 }
 0x2df   : > { %v1347_v24 = vpop.eup %1033  ;;  %v590_v25 = vmul.f32 1.442695, %v569_v22  ;;  %v572_v26 = vsub.f32 %v502_v50, %v549_v23  ;;  %1041 = vpow2.f32 %v592_v21 }
 0x2e0   : > { %614 = vadd.xlane.f32.xlu0 %v1347_v24  ;;  %v547_v27 = vpop.xlane.xlu0 %546 }
 0x2e1   : > { %1043 = vpow2.f32 %v590_v25  ;;  %v596_v28 = vmul.f32 1.442695, %v572_v26  ;;  %v571_v29 = vsub.f32 %v497_v53, %v547_v27 }
 0x2e2   : > { %v553_v30 = vpop.xlane.xlu1 %552 }
 0x2e3   : > { %v1350_v31 = vpop.eup %1035  ;;  %v594_v32 = vmul.f32 1.442695, %v571_v29  ;;  %v574_v33 = vsub.f32 %v1323_v54, %v553_v30  ;;  %1045 = vpow2.f32 %v596_v28 }
 0x2e4   : > { %v551_v34 = vpop.xlane.xlu0 %550  ;;  %616 = vadd.xlane.f32.xlu1 %v1350_v31 }
 0x2e5   : > { %1047 = vpow2.f32 %v594_v32  ;;  %v600_v35 = vmul.f32 1.442695, %v574_v33  ;;  %v573_v36 = vsub.f32 %v1325_v55, %v551_v34  ;;  %v1355_v37 = vpop.eup %1037 }
 0x2e6   : > { %v557_v38 = vpop.xlane.xlu1 %556 }
 0x2e7   : > { %v1357_v39 = vpop.eup %1039  ;;  %v598_v40 = vmul.f32 1.442695, %v573_v36  ;;  %v576_v41 = vsub.f32 %v1330_v59, %v557_v38  ;;  %1049 = vpow2.f32 %v600_v35 }
 0x2e8   : > { %618 = vadd.xlane.f32.xlu0 %v1357_v39  ;;  %v555_v42 = vpop.xlane.xlu0 %554  ;;  %620 = vadd.xlane.f32.xlu1 %v1355_v37 }
 0x2e9   : > { %1051 = vpow2.f32 %v598_v40  ;;  %v604_v43 = vmul.f32 1.442695, %v576_v41  ;;  %v575_v44 = vsub.f32 %v1328_v58, %v555_v42  ;;  %v1363_v45 = vpop.eup %1041 }
 0x2ea   : > { %v561_v46 = vpop.xlane.xlu1 %560 }
 0x2eb   : > { %v1365_v47 = vpop.eup %1043  ;;  %v602_v48 = vmul.f32 1.442695, %v575_v44  ;;  %v578_v49 = vsub.f32 %v1333_v62, %v561_v46  ;;  %1053 = vpow2.f32 %v604_v43 }
 0x2ec   : > { %622 = vadd.xlane.f32.xlu0 %v1365_v47  ;;  %v559_v50 = vpop.xlane.xlu0 %558  ;;  %624 = vadd.xlane.f32.xlu1 %v1363_v45 }
 0x2ed   : > { %1055 = vpow2.f32 %v602_v48  ;;  %v608_v51 = vmul.f32 1.442695, %v578_v49  ;;  %v577_v52 = vsub.f32 %v1337_v63, %v559_v50  ;;  %v1371_v53 = vpop.eup %1045 }
 0x2ef   : > { %v1373_v54 = vpop.eup %1047  ;;  %v606_v55 = vmul.f32 1.442695, %v577_v52  ;;  %1057 = vpow2.f32 %v608_v51 }
 0x2f0   : > { %626 = vadd.xlane.f32.xlu0 %v1373_v54  ;;  %v563_v56 = vpop.xlane.xlu0 %562  ;;  %628 = vadd.xlane.f32.xlu1 %v1371_v53 }
 0x2f1   : > { %1059 = vpow2.f32 %v606_v55  ;;  %v579_v57 = vsub.f32 %v1340_v0, %v563_v56  ;;  %v1378_v58 = vpop.eup %1049 }
 0x2f3   : > { %v1380_v59 = vpop.eup %1051  ;;  %v610_v60 = vmul.f32 1.442695, %v579_v57 }
 0x2f4   : > { %630 = vadd.xlane.f32.xlu0 %v1380_v59  ;;  %632 = vadd.xlane.f32.xlu1 %v1378_v58 }
 0x2f5   : > { %1061 = vpow2.f32 %v610_v60  ;;  %v1384_v61 = vpop.eup %1053 }
 0x2f7   : > { %v1386_v62 = vpop.eup %1055 }
 0x2f8   : > { %634 = vadd.xlane.f32.xlu0 %v1386_v62  ;;  %636 = vadd.xlane.f32.xlu1 %v1384_v61 }
 0x2f9   : > { %v1390_v63 = vpop.eup %1057 }
 0x2fb   : > { %v1392_v0 = vpop.eup %1059 }
 0x2fc   : > { %638 = vadd.xlane.f32.xlu0 %v1392_v0  ;;  %640 = vadd.xlane.f32.xlu1 %v1390_v63 }
 0x2ff   : > { %v1397_v2 = vpop.eup %1061 }
 0x300   : > { %642 = vadd.xlane.f32.xlu0 %v1397_v2 }
 0x30d   : > { %295 = vperm.xlu1 %1025, %v281_v3  }
 0x36b   : > { %v613_v4 = vpop.xlane.xlu1 %612 }
 0x36c   : > { %1063 = vrcp.f32 %v613_v4 }
 0x36d   : > { %v615_v5 = vpop.xlane.xlu0 %614 }
 0x36e   : > { %1065 = vrcp.f32 %v615_v5 }
 0x371   : > { %v617_v6 = vpop.xlane.xlu1 %616 }
 0x372   : > { %1067 = vrcp.f32 %v617_v6 }
 0x375   : > { %v619_v7 = vpop.xlane.xlu0 %618  ;;  %v621_v11 = vpop.xlane.xlu1 %620 }
 0x376   : > { %v1064_v9 = vpop.eup %1063  ;;  %1069 = vrcp.f32 %v619_v7 }
 0x377   : > { %v660_v13 = vmul.f32 %v1064_v9, %v1344_v20 }
 0x378   : > { %v1066_v10 = vpop.eup %1065 }
 0x379   : > { %v623_v12 = vpop.xlane.xlu0 %622  ;;  %v661_v14 = vmul.f32 %v1066_v10, %v1347_v24  ;;  %v625_v19 = vpop.xlane.xlu1 %624 }
 0x37a   : > { %1071 = vrcp.f32 %v623_v12 }
 0x37b   : > { %v676_v15 = vpack.c.bf16 %v661_v14, %v660_v13  ;;  %1073 = vrcp.f32 %v621_v11 }
 0x37c   : > { %v1068_v16 = vpop.eup %1067 }
 0x37d   : > { %930 = vmatpush3.bf16.xpose.msra.mxu1 %v676_v15  ;;  %v627_v17 = vpop.xlane.xlu0 %626  ;;  %v662_v21 = vmul.f32 %v1068_v16, %v1350_v31  ;;  %v629_v27 = vpop.xlane.xlu1 %628 }
 0x37e   : > { %931 = vmatprep.subr.bf16.mxu1 %v1193_v1  ;;  %1075 = vrcp.f32 %v627_v17 }
 0x37f   : > { %1077 = vrcp.f32 %v625_v19 }
 0x380   : > { %v1070_v18 = vpop.eup %1069 }
 0x381   : > { %v663_v22 = vmul.f32 %v1070_v18, %v1357_v39  ;;  %v631_v24 = vpop.xlane.xlu0 %630  ;;  %v633_v34 = vpop.xlane.xlu1 %632 }
 0x382   : > { %1079 = vrcp.f32 %v631_v24 }
 0x383   : > { %v677_v23 = vpack.c.bf16 %v663_v22, %v662_v21  ;;  %1081 = vrcp.f32 %v629_v27 }
 0x384   : > { %v1072_v25 = vpop.eup %1071 }
 0x385   : > { %932 = vmatpush3.bf16.xpose.msra.mxu1 %v677_v23  ;;  %v1074_v20 = vpop.eup %1073  ;;  %v665_v26 = vmul.f32 %v1072_v25, %v1365_v47  ;;  %v635_v32 = vpop.xlane.xlu0 %634 }
 0x386   : > { %933 = vmatprep.subr.bf16.mxu1 %v1193_v1  ;;  %v664_v28 = vmul.f32 %v1074_v20, %v1355_v37  ;;  %1083 = vrcp.f32 %v635_v32  ;;  %v637_v41 = vpop.xlane.xlu1 %636 }
 0x387   : > { %1085 = vrcp.f32 %v633_v34 }
 0x388   : > { %v678_v29 = vpack.c.bf16 %v665_v26, %v664_v28  ;;  %v1076_v30 = vpop.eup %1075 }
 0x389   : > { %v1078_v31 = vpop.eup %1077  ;;  %v667_v33 = vmul.f32 %v1076_v30, %v1373_v54  ;;  %v639_v39 = vpop.xlane.xlu0 %638 }
 0x38a   : > { %v666_v35 = vmul.f32 %v1078_v31, %v1363_v45  ;;  %1087 = vrcp.f32 %v639_v39  ;;  %v641_v48 = vpop.xlane.xlu1 %640 }
 0x38b   : > { %1089 = vrcp.f32 %v637_v41 }
 0x38c   : > { %v679_v36 = vpack.c.bf16 %v667_v33, %v666_v35  ;;  %v1080_v38 = vpop.eup %1079 }
 0x38d   : > { %934 = vmatpush3.bf16.xpose.msra.mxu1 %v678_v29  ;;  %v1082_v37 = vpop.eup %1081  ;;  %v669_v40 = vmul.f32 %v1080_v38, %v1380_v59  ;;  %v643_v46 = vpop.xlane.xlu0 %642 }
 0x38e   : > { %935 = vmatprep.subr.bf16.mxu1 %v1193_v1  ;;  %v668_v42 = vmul.f32 %v1082_v37, %v1371_v53  ;;  %1091 = vrcp.f32 %v643_v46  ;;  %v296_v60 = vpop.permute.xlu1 %295 }
 0x38f   : > { %1093 = vrcp.f32 %v641_v48  ;;  %v368_v3 = vadd.f32 %v1313_v8, %v296_v60 }
 0x390   : > { %v680_v43 = vpack.c.bf16 %v669_v40, %v668_v42  ;;  %v1084_v44 = vpop.eup %1083 }
 0x391   : > { %v1086_v45 = vpop.eup %1085  ;;  %v671_v47 = vmul.f32 %v1084_v44, %v1386_v62 }
 0x392   : > { %v670_v49 = vmul.f32 %v1086_v45, %v1378_v58 }
 0x394   : > { %v681_v50 = vpack.c.bf16 %v671_v47, %v670_v49  ;;  %v1088_v51 = vpop.eup %1087 }
 0x395   : > { %936 = vmatpush3.bf16.xpose.msra.mxu1 %v679_v36  ;;  %v1090_v52 = vpop.eup %1089  ;;  %v673_v53 = vmul.f32 %v1088_v51, %v1392_v0  ;;  %v375_v0 = vpack.c.bf16 %v368_v3, %v368_v3 }
 0x396   : > { %937 = vmatprep.subr.bf16.mxu1 %v1193_v1  ;;  %v672_v54 = vmul.f32 %v1090_v52, %v1384_v61 }
 0x398   : > { %v682_v55 = vpack.c.bf16 %v673_v53, %v672_v54  ;;  %v1092_v56 = vpop.eup %1091 }
 0x399   : > { %v1094_v57 = vpop.eup %1093  ;;  %v675_v58 = vmul.f32 %v1092_v56, %v1397_v2 }
 0x39a   : > { %v674_v59 = vmul.f32 %v1094_v57, %v1390_v63 }
 0x39c   : > { %v683_v62 = vpack.c.bf16 %v675_v58, %v674_v59 }
 0x39d   : > { %938 = vmatpush3.bf16.xpose.msra.mxu1 %v680_v43 }
 0x39e   : > { %939 = vmatprep.subr.bf16.mxu1 %v1193_v1 }
 0x3a5   : > { %940 = vmatpush3.bf16.xpose.msra.mxu1 %v681_v50 }
 0x3a6   : > { %941 = vmatprep.subr.bf16.mxu1 %v1193_v1 }
 0x3ad   : > { %942 = vmatpush3.bf16.xpose.msra.mxu1 %v682_v55 }
 0x3ae   : > { %943 = vmatprep.subr.bf16.mxu1 %v1193_v1 }
 0x3b5   : > { %944 = vmatpush3.bf16.xpose.msra.mxu1 %v683_v62 }
 0x3bc   : > { %946 = vmatmul.mubr.bf16.vlgmr.msra.gmra.mrb[0].mxu1 %v375_v0 }
 0x48f   : > { %v718_v8 = vpop.f32.mrb[0].mxu1 }
 0x490   : > { %724 = vst [vmem:[%s249_s30] sm:$0xff] %v718_v8  ;;  %v947_v61 = vpop.f32.mrb[1].mxu1 }
 0x491   : > { %v721_v63 = vpop.f32.mrb[2].mxu1 }
 0x492   : > { %1108 = shalt.err (!%p1105_p9)
}
 0x493   : > { %s1109_s14 = scalar_lea.hbm %s1434_s10, 128  ;;  %s1113_s27 = scalar_lea.hbm %s1489_s4, 1024 }
 0x494   : > { %p1110_p10 = scmp.ne.s32.totalorder %s1434_s10, %s1109_s14  ;;  %p1114_p13 = scmp.lt.u32.totalorder %s1434_s10, %s1489_s4 }
 0x495   : > { %p1115_p0 = scmp.lt.u32.totalorder %s1113_s27, %s1109_s14  ;;  %p1117_p2 = scmp.lt.u32.totalorder %s1109_s14, %s1434_s10 }
 0x496   : > { %p1111_p11 = pnand %p1110_p10, %p1272_p3 }
 0x497   : > { %p1116_p1 = por %p1115_p0, %p1114_p13 }
 0x498   : > { %p1112_p12 = pneg %p1111_p11 }
 0x499   : > { %p1118_p4 = por %p1117_p2, %p1116_p1 }
 0x49b   : > { %p1119_p5 = pnand %p1118_p4, %p1112_p12 }
 0x49d   : > { %1122 = shalt.err (!%p1119_p5)
}
 0x49e   : > { %949 = dma.vmem_to_hbm [thread:$0]  (%p1272_p3), %s1429_s5, 128, %s1434_s10, %s726_s11   ;;  %v948_v1 = vpop.f32.mrb[3].mxu1 }
 0x49f PF: > { %p955_p6 = scmp.ge.s32.totalorder %s1189_s22, 2  ;;  %s753_s9 = sand.u32 1, %s1161_s15  }
 0x4a0   : > { %s754_s8 = scalar_lea.sflag [#allocation3], %s753_s9 }
 0x4a1   : > { %p952_p7 = pnand %p955_p6, %p1281_p8 }
 0x4a3   : > { %1156 = dma.done.wait (!%p952_p7), %s754_s8, 128  }
 0x4a4   : > { %1158 = vsyncadd (!%p952_p7), %s754_s8, 4294967168  ;;  %s17_s22 = sadd.s32 1, %s1189_s22   ;;  %s1492_s15 = smov %s1165_s16 }
 0x4a5   : > { %p14_p9 = scmp.ge.s32.totalorder %s17_s22, 10   ;;  %s1493_s16 = smov %s1169_s17 }
 0x4a6   : > { %s1494_s17 = smov %s1290_s7  ;;  %s1495_s18 = smov %s1181_s20 }
 0x4a7   : > { %s1496_s19 = smov %s1185_s21  ;;  %s1497_s20 = smov %s1500_s25 }
 0x4a8   : > { %s1498_s21 = smov %s1504_s26  ;;  %16 = sbr.rel (!%p14_p9) target bundleno = 5 (0x5), region = 80 }
 0x4af   :  { %759 = vsyncpa [#allocation3], 1 }
 0x4b0   :  { %761 = vsyncpa [#allocation3 + $0x1], 1 }

</bundles_post_ra>
